<compile_context>
chip_gen: v7x
topology: tpu7x:2x2x1
jax: 0.10.0
libtpu: 0.0.40
codegen_flags: <defaults>
</compile_context>

<pallas_src>
import functools

import jax
import jax.numpy as jnp
from jax.experimental import pallas as pl
from jax.experimental.pallas import tpu as pltpu


def _actor_kernel(const_ref, obs_ref, w1_ref, b1_ref, w2_ref, b2_ref,
                  wm_ref, bm_ref, std_ref, *rest, deterministic):
    if deterministic:
        a_ref, logpi_ref = rest
    else:
        noise_ref, a_ref, logpi_ref = rest

    # --- MLP trunk: MXU inputs in weight dtype, f32 accumulation ------------
    x = obs_ref[...].astype(w1_ref.dtype)
    h = jnp.dot(x, w1_ref[...], preferred_element_type=jnp.float32) + b1_ref[...]
    h = jnp.maximum(h, 0.0)
    h = jnp.dot(h.astype(w2_ref.dtype), w2_ref[...],
                preferred_element_type=jnp.float32) + b2_ref[...]
    h = jnp.maximum(h, 0.0)
    mean = jnp.dot(h.astype(wm_ref.dtype), wm_ref[...],
                   preferred_element_type=jnp.float32) + bm_ref[...]

    # --- reparameterized sample (z == noise by construction) ----------------
    if deterministic:
        a = mean
        gauss = 0.0                       # z == 0  =>  -0.5*z*z == 0
    else:
        noise = noise_ref[...]
        a = mean + std_ref[...] * noise
        gauss = -0.5 * noise * noise

    # --- tanh-squash correction: 2*(log(2) - a - softplus(-2a)) -------------
    neg2a = -2.0 * a
    softplus = jnp.maximum(neg2a, 0.0) + jnp.log1p(jnp.exp(-jnp.abs(neg2a)))
    corr = 2.0 * (jnp.log(2.0) - a - softplus)

    # --- single fused lane reduction; scalar Gaussian constant from SMEM ----
    log_pi = jnp.sum(gauss - corr, axis=1, keepdims=True) - const_ref[0]

    a_ref[...] = jnp.tanh(a).astype(a_ref.dtype)
    logpi_ref[...] = log_pi.astype(logpi_ref.dtype)


@functools.partial(jax.jit, static_argnames=("deterministic", "block_b"))
def actor_forward(obs, params, noise=None, deterministic=False, block_b=1024):
    """Returns (tanh-squashed action, log_pi) matching Actor.forward with
    with_logprob=True.  `noise` is a (B, A) standard-normal sample used for the
    reparameterized draw (ignored / not required when deterministic=True)."""
    w1, b1, w2, b2, wm, bm, log_std = params
    B = obs.shape[0]
    A = wm.shape[1]

    # Parameter-only precompute: clamp, std, and the scalar Gaussian constant.
    log_std_c = jnp.clip(log_std.astype(jnp.float32), -20.0, 2.0)      # (1, A)
    std = jnp.exp(log_std_c)                                           # (1, A)
    const = (jnp.sum(log_std_c) + 0.5 * A * jnp.log(2.0 * jnp.pi)).reshape(1)

    tb = B if B <= block_b else block_b          # only the batch axis is tiled
    grid = (pl.cdiv(B, tb),)

    def resident(shape):
        return pl.BlockSpec(shape, lambda i: tuple(0 for _ in shape))

    def batched(cols):
        return pl.BlockSpec((tb, cols), lambda i: (i, 0))

    in_specs = [
        pl.BlockSpec(memory_space=pltpu.MemorySpace.SMEM),  # scalar const
        batched(obs.shape[1]),                              # obs (blocked)
        resident(w1.shape), resident(b1.shape),             # weights resident
        resident(w2.shape), resident(b2.shape),
        resident(wm.shape), resident(bm.shape),
        resident(std.shape),
    ]
    args = [const, obs.astype(jnp.float32), w1, b1, w2, b2, wm, bm, std]
    if not deterministic:
        in_specs.append(batched(A))                         # noise (blocked)
        args.append(noise.astype(jnp.float32))

    kernel = functools.partial(_actor_kernel, deterministic=deterministic)

    a, log_pi = pl.pallas_call(
        kernel,
        out_shape=(
            jax.ShapeDtypeStruct((B, A), jnp.float32),
            jax.ShapeDtypeStruct((B, 1), jnp.float32),
        ),
        grid=grid,
        in_specs=in_specs,
        out_specs=(batched(A), batched(1)),
        compiler_params=pltpu.CompilerParams(
            dimension_semantics=("parallel",)),              # v7x: 2 TCs
    )(*args)
    return a, log_pi


def init_actor_params(key, obs_dim, action_dim, hidden_1=128, hidden_2=128,
                      mxu_dtype=jnp.bfloat16):
    """Synthetic init (uniform, roughly PyTorch Linear default).  Weights are
    stored already transposed (in, out) and in `mxu_dtype` (bf16 feeds the
    bf16-native MXU on v5e/v6e/v7x); biases / log_std stay f32."""
    ks = jax.random.split(key, 6)

    def lin(kw, kb, fan_in, fan_out):
        bound = 1.0 / jnp.sqrt(float(fan_in))
        w = jax.random.uniform(kw, (fan_in, fan_out), jnp.float32, -bound, bound)
        b = jax.random.uniform(kb, (1, fan_out), jnp.float32, -bound, bound)
        return w.astype(mxu_dtype), b

    w1, b1 = lin(ks[0], ks[1], obs_dim, hidden_1)
    w2, b2 = lin(ks[2], ks[3], hidden_1, hidden_2)
    wm, bm = lin(ks[4], ks[5], hidden_2, action_dim)
    log_std = jnp.zeros((1, action_dim), jnp.float32)  # nn.Parameter(zeros(1,A))
    return (w1, b1, w2, b2, wm, bm, log_std)


def _actor_reference(obs, params, noise, deterministic=False):
    """Pure-JAX reference mirroring the PyTorch Actor (same MXU dtype path)."""
    w1, b1, w2, b2, wm, bm, log_std = params

    def dot(x, w):
        return jnp.dot(x.astype(w.dtype), w, preferred_element_type=jnp.float32)

    x = jax.nn.relu(dot(obs, w1) + b1)
    x = jax.nn.relu(dot(x, w2) + b2)
    mean = dot(x, wm) + bm
    log_std_c = jnp.clip(log_std, -20.0, 2.0)
    std = jnp.exp(log_std_c)
    a = mean if deterministic else mean + std * noise
    log_prob = (-0.5 * ((a - mean) / std) ** 2
                - log_std_c - 0.5 * jnp.log(2.0 * jnp.pi))
    log_pi = jnp.sum(log_prob, axis=1, keepdims=True)
    corr = 2.0 * (jnp.log(2.0) - a - jax.nn.softplus(-2.0 * a))
    log_pi = log_pi - jnp.sum(corr, axis=1, keepdims=True)
    return jnp.tanh(a), log_pi


if __name__ == "__main__":
    obs_dim, action_dim = 16, 4
    batch = 8

    key = jax.random.PRNGKey(0)
    k_params, k_obs, k_noise = jax.random.split(key, 3)

    params = init_actor_params(k_params, obs_dim, action_dim)
    obs = jax.random.normal(k_obs, (batch, obs_dim), jnp.float32)
    noise = jax.random.normal(k_noise, (batch, action_dim), jnp.float32)

    # stochastic path
    a, log_pi = actor_forward(obs, params, noise, deterministic=False)
    # deterministic path (specialized kernel, no noise DMA)
    a_det, log_pi_det = actor_forward(obs, params, deterministic=True)
    jax.block_until_ready((a, log_pi, a_det, log_pi_det))

    assert a.shape == (batch, action_dim) and log_pi.shape == (batch, 1)
    assert a_det.shape == (batch, action_dim) and log_pi_det.shape == (batch, 1)

    a_ref, lp_ref = _actor_reference(obs, params, noise, deterministic=False)
    ad_ref, lpd_ref = _actor_reference(obs, params, noise, deterministic=True)
    assert jnp.allclose(a, a_ref, atol=1e-4, rtol=1e-4)
    assert jnp.allclose(log_pi, lp_ref, atol=1e-3, rtol=1e-3)
    assert jnp.allclose(a_det, ad_ref, atol=1e-4, rtol=1e-4)
    assert jnp.allclose(log_pi_det, lpd_ref, atol=1e-3, rtol=1e-3)

    print("KERNEL_OK")
</pallas_src>

<mosaic_0001>
module attributes {stable_mosaic.version = 11 : i64} {
  func.func @_actor_kernel(%arg0: i32, %arg1: memref<1xf32, #tpu.memory_space<smem>>, %arg2: memref<8x16xf32, #tpu.memory_space<vmem>>, %arg3: memref<16x128xbf16, #tpu.memory_space<vmem>>, %arg4: memref<1x128xf32, #tpu.memory_space<vmem>>, %arg5: memref<128x128xbf16, #tpu.memory_space<vmem>>, %arg6: memref<1x128xf32, #tpu.memory_space<vmem>>, %arg7: memref<128x4xbf16, #tpu.memory_space<vmem>>, %arg8: memref<1x4xf32, #tpu.memory_space<vmem>>, %arg9: memref<1x4xf32, #tpu.memory_space<vmem>>, %arg10: memref<8x4xf32, #tpu.memory_space<vmem>>, %arg11: memref<8x4xf32, #tpu.memory_space<vmem>>, %arg12: memref<8x1xf32, #tpu.memory_space<vmem>>) attributes {dimension_semantics = [#tpu.dimension_semantics<parallel>], iteration_bounds = array<i64: 1>, scalar_prefetch = 0 : i64, scratch_operands = 0 : i64, tpu.core_type = #tpu.core_type<tc>, window_params = [{transform_indices = @transform_0, window_bounds = array<i64: 1>}, {transform_indices = @transform_1, window_bounds = array<i64: 8, 16>}, {pipeline_mode = #tpu.pipeline_mode<synchronous>, transform_indices = @transform_2, window_bounds = array<i64: 16, 128>}, {pipeline_mode = #tpu.pipeline_mode<synchronous>, transform_indices = @transform_3, window_bounds = array<i64: 1, 128>}, {pipeline_mode = #tpu.pipeline_mode<synchronous>, transform_indices = @transform_4, window_bounds = array<i64: 128, 128>}, {pipeline_mode = #tpu.pipeline_mode<synchronous>, transform_indices = @transform_5, window_bounds = array<i64: 1, 128>}, {pipeline_mode = #tpu.pipeline_mode<synchronous>, transform_indices = @transform_6, window_bounds = array<i64: 128, 4>}, {pipeline_mode = #tpu.pipeline_mode<synchronous>, transform_indices = @transform_7, window_bounds = array<i64: 1, 4>}, {pipeline_mode = #tpu.pipeline_mode<synchronous>, transform_indices = @transform_8, window_bounds = array<i64: 1, 4>}, {transform_indices = @transform_9, window_bounds = array<i64: 8, 4>}, {transform_indices = @transform_10, window_bounds = array<i64: 8, 4>}, {transform_indices = @transform_11, window_bounds = array<i64: 8, 1>}]} {
    %c0 = arith.constant 0 : index
    %c0_0 = arith.constant 0 : index
    %0 = vector.load %arg2[%c0, %c0_0] : memref<8x16xf32, #tpu.memory_space<vmem>>, vector<8x16xf32>
    %1 = arith.truncf %0 : vector<8x16xf32> to vector<8x16xbf16>
    %c0_1 = arith.constant 0 : index
    %c0_2 = arith.constant 0 : index
    %2 = vector.load %arg3[%c0_1, %c0_2] : memref<16x128xbf16, #tpu.memory_space<vmem>>, vector<16x128xbf16>
    %cst = arith.constant dense<0.000000e+00> : vector<8x128xf32>
    %3 = tpu.matmul %1, %2, %cst {dimension_numbers = #tpu.dot_dimension_numbers<[1], [0], [0], [1], [0, 0, 1, 1], [], []>} : vector<8x16xbf16>, vector<16x128xbf16>, vector<8x128xf32> -> vector<8x128xf32>
    %c0_3 = arith.constant 0 : index
    %c0_4 = arith.constant 0 : index
    %4 = vector.load %arg4[%c0_3, %c0_4] : memref<1x128xf32, #tpu.memory_space<vmem>>, vector<1x128xf32>
    %5 = vector.broadcast %4 : vector<1x128xf32> to vector<8x128xf32>
    %6 = arith.addf %3, %5 : vector<8x128xf32>
    %cst_5 = arith.constant 0.000000e+00 : f32
    %7 = vector.broadcast %cst_5 : f32 to vector<8x128xf32>
    %8 = arith.maximumf %6, %7 : vector<8x128xf32>
    %9 = arith.truncf %8 : vector<8x128xf32> to vector<8x128xbf16>
    %c0_6 = arith.constant 0 : index
    %c0_7 = arith.constant 0 : index
    %10 = vector.load %arg5[%c0_6, %c0_7] : memref<128x128xbf16, #tpu.memory_space<vmem>>, vector<128x128xbf16>
    %cst_8 = arith.constant dense<0.000000e+00> : vector<8x128xf32>
    %11 = tpu.matmul %9, %10, %cst_8 {dimension_numbers = #tpu.dot_dimension_numbers<[1], [0], [0], [1], [0, 0, 1, 1], [], []>} : vector<8x128xbf16>, vector<128x128xbf16>, vector<8x128xf32> -> vector<8x128xf32>
    %c0_9 = arith.constant 0 : index
    %c0_10 = arith.constant 0 : index
    %12 = vector.load %arg6[%c0_9, %c0_10] : memref<1x128xf32, #tpu.memory_space<vmem>>, vector<1x128xf32>
    %13 = vector.broadcast %12 : vector<1x128xf32> to vector<8x128xf32>
    %14 = arith.addf %11, %13 : vector<8x128xf32>
    %cst_11 = arith.constant 0.000000e+00 : f32
    %15 = vector.broadcast %cst_11 : f32 to vector<8x128xf32>
    %16 = arith.maximumf %14, %15 : vector<8x128xf32>
    %17 = arith.truncf %16 : vector<8x128xf32> to vector<8x128xbf16>
    %c0_12 = arith.constant 0 : index
    %c0_13 = arith.constant 0 : index
    %18 = vector.load %arg7[%c0_12, %c0_13] : memref<128x4xbf16, #tpu.memory_space<vmem>>, vector<128x4xbf16>
    %cst_14 = arith.constant dense<0.000000e+00> : vector<8x4xf32>
    %19 = tpu.matmul %17, %18, %cst_14 {dimension_numbers = #tpu.dot_dimension_numbers<[1], [0], [0], [1], [0, 0, 1, 1], [], []>} : vector<8x128xbf16>, vector<128x4xbf16>, vector<8x4xf32> -> vector<8x4xf32>
    %c0_15 = arith.constant 0 : index
    %c0_16 = arith.constant 0 : index
    %20 = vector.load %arg8[%c0_15, %c0_16] : memref<1x4xf32, #tpu.memory_space<vmem>>, vector<1x4xf32>
    %21 = vector.broadcast %20 : vector<1x4xf32> to vector<8x4xf32>
    %22 = arith.addf %19, %21 : vector<8x4xf32>
    %c0_17 = arith.constant 0 : index
    %c0_18 = arith.constant 0 : index
    %23 = vector.load %arg10[%c0_17, %c0_18] : memref<8x4xf32, #tpu.memory_space<vmem>>, vector<8x4xf32>
    %c0_19 = arith.constant 0 : index
    %c0_20 = arith.constant 0 : index
    %24 = vector.load %arg9[%c0_19, %c0_20] : memref<1x4xf32, #tpu.memory_space<vmem>>, vector<1x4xf32>
    %25 = vector.broadcast %24 : vector<1x4xf32> to vector<8x4xf32>
    %26 = arith.mulf %25, %23 : vector<8x4xf32>
    %27 = arith.addf %22, %26 : vector<8x4xf32>
    %cst_21 = arith.constant -5.000000e-01 : f32
    %28 = vector.broadcast %cst_21 : f32 to vector<8x4xf32>
    %29 = arith.mulf %28, %23 : vector<8x4xf32>
    %30 = arith.mulf %29, %23 : vector<8x4xf32>
    %cst_22 = arith.constant -2.000000e+00 : f32
    %31 = vector.broadcast %cst_22 : f32 to vector<8x4xf32>
    %32 = arith.mulf %31, %27 : vector<8x4xf32>
    %cst_23 = arith.constant 0.000000e+00 : f32
    %33 = vector.broadcast %cst_23 : f32 to vector<8x4xf32>
    %34 = arith.maximumf %32, %33 : vector<8x4xf32>
    %35 = math.absf %32 : vector<8x4xf32>
    %cst_24 = arith.constant 0.000000e+00 : f32
    %36 = vector.broadcast %cst_24 : f32 to vector<8x4xf32>
    %37 = arith.subf %36, %35 : vector<8x4xf32>
    %38 = math.exp %37 : vector<8x4xf32>
    %39 = math.log1p %38 : vector<8x4xf32>
    %40 = arith.addf %34, %39 : vector<8x4xf32>
    %cst_25 = arith.constant 2.000000e+00 : f32
    %41 = math.log %cst_25 : f32
    %42 = vector.broadcast %41 : f32 to vector<8x4xf32>
    %43 = arith.subf %42, %27 : vector<8x4xf32>
    %44 = arith.subf %43, %40 : vector<8x4xf32>
    %cst_26 = arith.constant 2.000000e+00 : f32
    %45 = vector.broadcast %cst_26 : f32 to vector<8x4xf32>
    %46 = arith.mulf %45, %44 : vector<8x4xf32>
    %47 = arith.subf %30, %46 : vector<8x4xf32>
    %cst_27 = arith.constant dense<0.000000e+00> : vector<8xf32>
    %48 = vector.multi_reduction <add>, %47, %cst_27 [1] : vector<8x4xf32> to vector<8xf32>
    %49 = vector.shape_cast %48 : vector<8xf32> to vector<8x1xf32>
    %c0_28 = arith.constant 0 : index
    %50 = memref.load %arg1[%c0_28] : memref<1xf32, #tpu.memory_space<smem>>
    %51 = vector.broadcast %50 : f32 to vector<8x1xf32>
    %52 = arith.subf %49, %51 : vector<8x1xf32>
    %53 = math.tanh %27 : vector<8x4xf32>
    %c0_29 = arith.constant 0 : index
    %c0_30 = arith.constant 0 : index
    %54 = vector.load %arg11[%c0_29, %c0_30] : memref<8x4xf32, #tpu.memory_space<vmem>>, vector<8x4xf32>
    tpu.vector_store %arg11[%c0_29, %c0_30], %53 {strides = array<i32>} : memref<8x4xf32, #tpu.memory_space<vmem>>, vector<8x4xf32>,
    %c0_31 = arith.constant 0 : index
    %c0_32 = arith.constant 0 : index
    %55 = vector.load %arg12[%c0_31, %c0_32] : memref<8x1xf32, #tpu.memory_space<vmem>>, vector<8x1xf32>
    tpu.vector_store %arg12[%c0_31, %c0_32], %52 {strides = array<i32>} : memref<8x1xf32, #tpu.memory_space<vmem>>, vector<8x1xf32>,
    return
  }
  func.func @transform_0(%arg0: i32) -> i32 {
    %c0_i32 = arith.constant 0 : i32
    %c0_i32_0 = arith.constant 0 : i32
    return %c0_i32 : i32
  }
  func.func @transform_1(%arg0: i32) -> (i32, i32) {
    %c0_i32 = arith.constant 0 : i32
    %c0_i32_0 = arith.constant 0 : i32
    return %arg0, %c0_i32 : i32, i32
  }
  func.func @transform_2(%arg0: i32) -> (i32, i32) {
    %c0_i32 = arith.constant 0 : i32
    %c0_i32_0 = arith.constant 0 : i32
    %c0_i32_1 = arith.constant 0 : i32
    return %c0_i32, %c0_i32_0 : i32, i32
  }
  func.func @transform_3(%arg0: i32) -> (i32, i32) {
    %c0_i32 = arith.constant 0 : i32
    %c0_i32_0 = arith.constant 0 : i32
    %c0_i32_1 = arith.constant 0 : i32
    return %c0_i32, %c0_i32_0 : i32, i32
  }
  func.func @transform_4(%arg0: i32) -> (i32, i32) {
    %c0_i32 = arith.constant 0 : i32
    %c0_i32_0 = arith.constant 0 : i32
    %c0_i32_1 = arith.constant 0 : i32
    return %c0_i32, %c0_i32_0 : i32, i32
  }
  func.func @transform_5(%arg0: i32) -> (i32, i32) {
    %c0_i32 = arith.constant 0 : i32
    %c0_i32_0 = arith.constant 0 : i32
    %c0_i32_1 = arith.constant 0 : i32
    return %c0_i32, %c0_i32_0 : i32, i32
  }
  func.func @transform_6(%arg0: i32) -> (i32, i32) {
    %c0_i32 = arith.constant 0 : i32
    %c0_i32_0 = arith.constant 0 : i32
    %c0_i32_1 = arith.constant 0 : i32
    return %c0_i32, %c0_i32_0 : i32, i32
  }
  func.func @transform_7(%arg0: i32) -> (i32, i32) {
    %c0_i32 = arith.constant 0 : i32
    %c0_i32_0 = arith.constant 0 : i32
    %c0_i32_1 = arith.constant 0 : i32
    return %c0_i32, %c0_i32_0 : i32, i32
  }
  func.func @transform_8(%arg0: i32) -> (i32, i32) {
    %c0_i32 = arith.constant 0 : i32
    %c0_i32_0 = arith.constant 0 : i32
    %c0_i32_1 = arith.constant 0 : i32
    return %c0_i32, %c0_i32_0 : i32, i32
  }
  func.func @transform_9(%arg0: i32) -> (i32, i32) {
    %c0_i32 = arith.constant 0 : i32
    %c0_i32_0 = arith.constant 0 : i32
    return %arg0, %c0_i32 : i32, i32
  }
  func.func @transform_10(%arg0: i32) -> (i32, i32) {
    %c0_i32 = arith.constant 0 : i32
    %c0_i32_0 = arith.constant 0 : i32
    return %arg0, %c0_i32 : i32, i32
  }
  func.func @transform_11(%arg0: i32) -> (i32, i32) {
    %c0_i32 = arith.constant 0 : i32
    %c0_i32_0 = arith.constant 0 : i32
    return %arg0, %c0_i32 : i32, i32
  }
}

</mosaic_0001>

<bundles_post_ra>
// kernel: actor_forward.1
= control target key start
LH: loop header
LB: loop body
LE: loop exit
PB: predicated region body
PF: predicated region fallthrough
CT: control target
= control target key end

     0   :  { %v490_v0 = vmov 0.0   ;;  %vm491_vm0 = vmmov 0   ;;  %vm56_vm1 = vcmask 130048   ;;  %vm358_vm2 = vcmask 31744   ;;  %s652_s2 = inlined_call_operand.vmem [shape: bf16[16,128], index: 2, kind: input, shape index: {}]   ;;  %s653_s1 = inlined_call_operand.vmem [shape: f32[8,16], index: 1, kind: input, shape index: {}]   ;;  %s654_s4 = inlined_call_operand.vmem [shape: bf16[128,128], index: 4, kind: input, shape index: {}]   ;;  %s655_s6 = inlined_call_operand.vmem [shape: bf16[128,4], index: 6, kind: input, shape index: {}]   ;;  %s656_s3 = inlined_call_operand.vmem [shape: f32[1,128], index: 3, kind: input, shape index: {}]   ;;  %s657_s5 = inlined_call_operand.vmem [shape: f32[1,128], index: 5, kind: input, shape index: {}]   ;;  %s658_s8 = inlined_call_operand.vmem [shape: f32[1,4], index: 8, kind: input, shape index: {}]   ;;  %s659_s9 = inlined_call_operand.vmem [shape: f32[8,4], index: 9, kind: input, shape index: {}]   ;;  %s660_s7 = inlined_call_operand.vmem [shape: f32[1,4], index: 7, kind: input, shape index: {}]   ;;  %s661_s10 = inlined_call_operand.vmem [shape: f32[8,4], index: 10, kind: output, shape index: {0}]   ;;  %s662_s0 = inlined_call_operand.<no memory space> [shape: f32[1], index: 0, kind: input, shape index: {}]   ;;  %s663_s11 = inlined_call_operand.vmem [shape: f32[8,1], index: 11, kind: output, shape index: {1}]  }
   0x1   :  { %419 = vmatprep.subr.bf16.mxu0 %v490_v0  ;;  %v467_v1 = vld [vmem:[%s652_s2] sm:$0xff]   ;;  %421 = vmatprep.mubr.msk.bf16.mxu0 %vm491_vm0, %v490_v0  ;;  %v469_v5 = vld [vmem:[%s654_s4 + $0x8] sm:$0xff]   ;;  %v470_v6 = vld [vmem:[%s654_s4 + $0x10] sm:$0xff]   ;;  %vm367_vm4 = vcmask 7168  }
   0x2   :  { %v39_v2 = vld [vmem:[%s653_s1] sm:$0xff]  ;;  %425 = vmatprep.subr.bf16.mxu1 %v490_v0  ;;  %441 = vmatprep.mubr.msk.bf16.mxu1 %vm491_vm0, %v490_v0  ;;  %v471_v7 = vld [vmem:[%s654_s4 + $0x18] sm:$0xff]   ;;  %v473_v9 = vld [vmem:[%s654_s4 + $0x28] sm:$0xff]  }
   0x3   :  { %420 = vmatpush3.bf16.msra.mxu0 %v467_v1  ;;  %v40_v3 = vpack.c.bf16 %v39_v2, %v39_v2  ;;  %v468_v4 = vld [vmem:[%s654_s4] sm:$0xff]   ;;  %v474_v10 = vld [vmem:[%s654_s4 + $0x30] sm:$0xff]   ;;  %v475_v11 = vld [vmem:[%s654_s4 + $0x38] sm:$0xff]  }
   0x4   :  { %445 = vmatprep.subr.bf16.mxu0 %v490_v0  ;;  %426 = vmatpush3.bf16.msra.mxu1 %v468_v4  ;;  %v472_v8 = vld [vmem:[%s654_s4 + $0x20] sm:$0xff]   ;;  %v477_v13 = vld [vmem:[%s655_s6 + $0x8] sm:$0xff]   ;;  %v478_v14 = vld [vmem:[%s655_s6 + $0x10] sm:$0xff]  }
   0x5   :  { %427 = vmatprep.subr.bf16.mxu1 %v490_v0  ;;  %v476_v12 = vld [vmem:[%s655_s6] sm:$0xff]   ;;  %v479_v15 = vld [vmem:[%s655_s6 + $0x18] sm:$0xff]   ;;  %v481_v17 = vld [vmem:[%s655_s6 + $0x28] sm:$0xff]  }
   0x6   :  { %422 = vmatmul.mubr.msk.bf16.vlgmr.msra.gmra.mrb[0].mxu0 %vm56_vm1, %v40_v3  ;;  %v480_v16 = vld [vmem:[%s655_s6 + $0x20] sm:$0xff]   ;;  %v482_v26 = vld [vmem:[%s655_s6 + $0x30] sm:$0xff]   ;;  %v483_v27 = vld [vmem:[%s655_s6 + $0x38] sm:$0xff]  }
   0x7   :  { %461 = vmatprep.mubr.msk.bf16.mxu0 %vm491_vm0, %v490_v0  ;;  %446 = vmatpush3.bf16.msra.mxu0 %v476_v12  ;;  %v377_v18 = vld [vmem:[%s656_s3] ss:$0 sm:$0xff] }
   0x8   :  { %428 = vmatpush3.bf16.msra.mxu1 %v469_v5  ;;  %447 = vmatprep.subr.bf16.mxu0 %v490_v0  ;;  %v380_v28 = vld [vmem:[%s657_s5] ss:$0 sm:$0xff]  ;;  %v363_v5 = vstv %s662_s0 }
   0x9   :  { %429 = vmatprep.subr.bf16.mxu1 %v490_v0  ;;  %v326_v36 = vld [vmem:[%s659_s9] sm:$0xff] }
   0xa   :  { %v398_v37 = vld [vmem:[%s658_s8] ss:$0 sm:$0xff]  ;;  %v336_v59 = vmul.f32 -0.5, %v326_v36 }
   0xb   :  { %448 = vmatpush3.bf16.msra.mxu0 %v477_v13  ;;  %v389_v38 = vld [vmem:[%s660_s7] ss:$0 sm:$0xff]  ;;  %v334_v39 = vmul.f32 %v398_v37, %v326_v36 }
   0xc   :  { %430 = vmatpush3.bf16.msra.mxu1 %v470_v6  ;;  %449 = vmatprep.subr.bf16.mxu0 %v490_v0 }
   0xd   :  { %431 = vmatprep.subr.bf16.mxu1 %v490_v0 }
   0xf   :  { %450 = vmatpush3.bf16.msra.mxu0 %v478_v14 }
  0x10   :  { %432 = vmatpush3.bf16.msra.mxu1 %v471_v7  ;;  %451 = vmatprep.subr.bf16.mxu0 %v490_v0 }
  0x11   :  { %433 = vmatprep.subr.bf16.mxu1 %v490_v0 }
  0x13   :  { %452 = vmatpush3.bf16.msra.mxu0 %v479_v15 }
  0x14   :  { %434 = vmatpush3.bf16.msra.mxu1 %v472_v8  ;;  %453 = vmatprep.subr.bf16.mxu0 %v490_v0 }
  0x15   :  { %435 = vmatprep.subr.bf16.mxu1 %v490_v0 }
  0x17   :  { %454 = vmatpush3.bf16.msra.mxu0 %v480_v16 }
  0x18   :  { %436 = vmatpush3.bf16.msra.mxu1 %v473_v9  ;;  %455 = vmatprep.subr.bf16.mxu0 %v490_v0 }
  0x19   :  { %437 = vmatprep.subr.bf16.mxu1 %v490_v0 }
  0x1b   :  { %456 = vmatpush3.bf16.msra.mxu0 %v481_v17 }
  0x1c   :  { %438 = vmatpush3.bf16.msra.mxu1 %v474_v10  ;;  %457 = vmatprep.subr.bf16.mxu0 %v490_v0 }
  0x1d   :  { %439 = vmatprep.subr.bf16.mxu1 %v490_v0 }
  0x1f   :  { %458 = vmatpush3.bf16.msra.mxu0 %v482_v26 }
  0x20   :  { %440 = vmatpush3.bf16.msra.mxu1 %v475_v11  ;;  %459 = vmatprep.subr.bf16.mxu0 %v490_v0  ;;  %v337_v0 = vmul.f32 %v336_v59, %v326_v36 }
  0x23   :  { %460 = vmatpush3.bf16.msra.mxu0 %v483_v27 }
  0xd9   :  { %v94_v19 = vpop.f32.mrb[0].mxu0 }
  0xda   :  { %v95_v20 = vadd.f32 %v377_v18, %v94_v19  ;;  %v423_v21 = vpop.f32.mrb[1].mxu0 }
  0xdb   :  { %v97_v22 = vpop.f32.mrb[2].mxu0 }
  0xdc   :  { %v100_v23 = vmax.f32 %v95_v20, 0.0  ;;  %v424_v24 = vpop.f32.mrb[3].mxu0 }
  0xde   :  { %v101_v25 = vpack.c.bf16 %v100_v23, %v100_v23 }
  0xe0   :  { %442 = vmatmul.mubr.bf16.vlgmr.msra.gmra.mrb[0].mxu1 %v101_v25 }
 0x1b3   :  { %v207_v29 = vpop.f32.mrb[0].mxu1 }
 0x1b4   :  { %v208_v30 = vadd.f32 %v380_v28, %v207_v29  ;;  %v443_v31 = vpop.f32.mrb[1].mxu1 }
 0x1b5   :  { %v210_v32 = vpop.f32.mrb[2].mxu1 }
 0x1b6   :  { %v213_v33 = vmax.f32 %v208_v30, 0.0  ;;  %v444_v34 = vpop.f32.mrb[3].mxu1 }
 0x1b8   :  { %v214_v35 = vpack.c.bf16 %v213_v33, %v213_v33 }
 0x1ba   :  { %462 = vmatmul.mubr.bf16.vlgmr.msra.gmra.mrb[4].mxu0 %v214_v35 }
 0x28d   :  { %v320_v40 = vpop.f32.mrb[4].mxu0 }
 0x28e   :  { %v321_v41 = vadd.f32 %v389_v38, %v320_v40  ;;  %v463_v42 = vpop.f32.mrb[5].mxu0 }
 0x28f   :  { %v323_v43 = vpop.f32.mrb[6].mxu0 }
 0x290   :  { %v335_v44 = vadd.f32 %v334_v39, %v321_v41  ;;  %v464_v45 = vpop.f32.mrb[7].mxu0 }
 0x292   :  { %v338_v46 = vmul.f32 -2.0, %v335_v44  ;;  %484 = vtanh.f32 %v335_v44  ;;  %v354_v63 = vsub.f32 0.6931472, %v335_v44 }
 0x294   :  { %v340_v47 = vand.u32 2147483647, %v338_v46  ;;  %v339_v60 = vmax.f32 %v338_v46, 0.0 }
 0x296   :  { %v341_v48 = vsub.f32 0.0, %v340_v47 }
 0x298   :  { %v342_v49 = vmul.f32 1.442695, %v341_v48 }
 0x29a   :  { %486 = vpow2.f32 %v342_v49 }
 0x29c   :  { %v485_v50 = vpop.eup %484 }
 0x29d   :  { %366 = vst.msk [vmem:[%s661_s10] sm:$0xff] %vm358_vm2, %v485_v50 }
 0x2a4   :  { %v487_v51 = vpop.eup %486 }
 0x2a5   :  { %v344_v52 = vadd.f32 1.0, %v487_v51  ;;  %v347_v53 = vmul.f32 -0.5, %v487_v51  ;;  %v350_v55 = vand.u32 2147483647, %v487_v51 }
 0x2a7   :  { %488 = vlog2.f32 %v344_v52  ;;  %v348_v54 = vadd.f32 1.0, %v347_v53  ;;  %vm351_vm3 = vcmp.lt.f32.partialorder %v350_v55, 0.0004427343 }
 0x2a9   :  { %v349_v58 = vmul.f32 %v487_v51, %v348_v54 }
 0x2b1   :  { %v489_v56 = vpop.eup %488 }
 0x2b2   :  { %v346_v57 = vmul.f32 0.6931472, %v489_v56 }
 0x2b4   :  { %v352_v61 = vsel %vm351_vm3, %v349_v58, %v346_v57 }
 0x2b5   :  { %v353_v62 = vadd.f32 %v352_v61, %v339_v60 }
 0x2b7   :  { %v355_v1 = vsub.f32 %v354_v63, %v353_v62 }
 0x2b9   :  { %v356_v2 = vmul.f32 2.0, %v355_v1 }
 0x2bb   :  { %v357_v3 = vsub.f32 %v337_v0, %v356_v2 }
 0x2bd   :  { %v359_v4 = vsel %vm358_vm2, %v357_v3, 0.0 }
 0x2be   :  { %360 = vadd.xlane.f32.xlu0 %v359_v4 }
 0x34b   :  { %v361_v6 = vpop.xlane.xlu0 %360 }
 0x34c   :  { %v364_v7 = vsub.f32 %v361_v6, %v363_v5 }
 0x34e   :  { %368 = vst.msk [vmem:[%s663_s11] sm:$0xff] %vm367_vm4, %v364_v7 }

</bundles_post_ra>
